<compile_context>
chip_gen: v6e
topology: v6e:2x2x1
jax: 0.10.0
libtpu: 0.0.40
codegen_flags: <defaults>
</compile_context>

<pallas_src>
import jax
import jax.numpy as jnp
from jax.experimental import pallas as pl
from jax.experimental.pallas import tpu as pltpu


# ---------------------------------------------------------------------------
# Pallas kernel
# ---------------------------------------------------------------------------
def cmce_kernel(x_ref, weff_ref, wmf_ref, bnb_ref, wos_ref, out_ref):
    x = x_ref[0]                       # (2C, T)   activations, f32
    w_eff = weff_ref[0]                # (2C, 2C)  per-batch folded weight

    # mutual_enhance: relu(BN(conv1x1(cat[fa, fb]))) with the BN scale folded
    # into the conv weight (wm_f) — one full-K matmul, no half-K split.
    fused = jax.nn.relu(
        jnp.dot(wmf_ref[...], x, preferred_element_type=jnp.float32)
        + bnb_ref[...])                # (C, T)

    # output conv over (enhanced + [fused; fused]).  The channel-attention
    # enhancement (fa + fb*wa ; fb + fa*wb) and the half-swap are pre-folded
    # into w_eff; the duplicated fused term into wo_sum = wo[:, :C] + wo[:, C:].
    out = jax.nn.relu(
        jnp.dot(w_eff, x, preferred_element_type=jnp.float32)
        + jnp.dot(wos_ref[...], fused, preferred_element_type=jnp.float32))

    out_ref[0] = out.astype(out_ref.dtype)


def _pick_hw_tile(hw):
    # Lane (last-dim) tile: a multiple of 128 that divides HW, big enough to
    # amortize per-step overhead, small enough that double-buffered in/out
    # blocks stay well under v7x's 64 MiB VMEM even at large channel counts.
    for t in (2048, 1024, 512, 256, 128):
        if hw % t == 0:
            return t
    return hw  # not a multiple of 128: use the full extent (exempt from rule)


# ---------------------------------------------------------------------------
# Wrapper
# ---------------------------------------------------------------------------
def improved_cmce(x_nchw, params):
    """x_nchw: (B, 2*channels, H, W) float32, matching the PyTorch module input."""
    w1, w2, wm, bn_scale, bn_bias, wo = params
    B, C2, H, W = x_nchw.shape
    C = C2 // 2
    HW = H * W

    # NCHW -> (B, 2C, HW): pure reshape, no transpose, no channel split.
    x3 = x_nchw.reshape(B, C2, HW)

    # ---- channel attention (AdaptiveAvgPool2d(1) -> 1x1 conv -> ReLU ->
    # 1x1 conv -> sigmoid), hoisted out of the kernel so HW can be tiled.
    pooled = jnp.mean(x3, axis=2)                       # (B, 2C)
    pa, pb = pooled[:, :C], pooled[:, C:]
    wa = jax.nn.sigmoid(jax.nn.relu(pa @ w1) @ w2)      # (B, C)
    wb = jax.nn.sigmoid(jax.nn.relu(pb @ w1) @ w2)      # (B, C)
    sc = jnp.concatenate([wa, wb], axis=-1)             # (B, 2C) = [wa ; wb]

    # ---- fold enhancement + output conv into one per-batch weight:
    #   wo @ (x + swap(x)*sc) == (wo + colswap(wo * sc)) @ x
    a = wo[None, :, :] * sc[:, None, :]                                   # (B, 2C, 2C)
    w_eff = wo[None, :, :] + jnp.concatenate([a[:, :, C:], a[:, :, :C]], axis=-1)
    #   wo @ [fused; fused] == (wo[:, :C] + wo[:, C:]) @ fused
    wo_sum = wo[:, :C] + wo[:, C:]                                        # (2C, C)

    # ---- fold eval-mode BN scale into the mutual_enhance conv weight.
    wm_f = wm * bn_scale[:, None]                                         # (C, 2C)
    bnb = bn_bias[:, None]                                                # (C, 1)

    t_hw = _pick_hw_tile(HW)
    grid = (B, HW // t_hw)

    out = pl.pallas_call(
        cmce_kernel,
        out_shape=jax.ShapeDtypeStruct((B, C2, HW), x_nchw.dtype),
        grid_spec=pltpu.PrefetchScalarGridSpec(
            num_scalar_prefetch=0,
            grid=grid,
            in_specs=[
                pl.BlockSpec((1, C2, t_hw), lambda b, t: (b, 0, t)),   # activations
                pl.BlockSpec((1, C2, C2), lambda b, t: (b, 0, 0)),     # W_eff (per batch)
                pl.BlockSpec((C, C2), lambda b, t: (0, 0)),            # wm_f
                pl.BlockSpec((C, 1), lambda b, t: (0, 0)),             # bn bias
                pl.BlockSpec((C2, C), lambda b, t: (0, 0)),            # wo_sum
            ],
            out_specs=pl.BlockSpec((1, C2, t_hw), lambda b, t: (b, 0, t)),
        ),
        compiler_params=pltpu.CompilerParams(
            dimension_semantics=("parallel", "parallel"),
            vmem_limit_bytes=64 * 1024 * 1024,
        ),
    )(x3, w_eff, wm_f, bnb, wo_sum)

    # (B, 2C, HW) -> NCHW (free reshape).
    return out.reshape(B, C2, H, W)


# ---------------------------------------------------------------------------
# Parameters & pure-JAX reference (mirrors the PyTorch forward, eval-mode BN)
# ---------------------------------------------------------------------------
def init_params(channels, key, reduction_ratio=2):
    """Deterministic synthetic parameters, shaped per ImprovedCMCE.__init__."""
    mid = max(channels // reduction_ratio, 8)
    ks = jax.random.split(key, 6)
    # channel_attention convs stored so the (hoisted) wrapper computes p @ w1 @ w2.
    w1 = jax.random.normal(ks[0], (channels, mid), jnp.float32) * 0.1         # (C, mid)
    w2 = jax.random.normal(ks[1], (mid, channels), jnp.float32) * 0.1         # (mid, C)
    # 1x1 convs in PyTorch (out, in) orientation so the kernel computes W @ x.
    wm = jax.random.normal(ks[2], (channels, 2 * channels), jnp.float32) * 0.1
    wo = jax.random.normal(ks[3], (2 * channels, 2 * channels), jnp.float32) * 0.1
    # BatchNorm2d(channels), eval-mode, folded into per-channel scale/bias.
    gamma = 1.0 + 0.1 * jax.random.normal(ks[4], (channels,), jnp.float32)
    beta = 0.1 * jax.random.normal(ks[5], (channels,), jnp.float32)
    running_mean = jnp.zeros((channels,), jnp.float32)
    running_var = jnp.ones((channels,), jnp.float32)
    eps = 1e-5
    scale = gamma / jnp.sqrt(running_var + eps)
    bias = beta - running_mean * scale
    return (w1, w2, wm, scale, bias, wo)


def reference_cmce(x_nchw, params):
    """Pure-JAX reference mirroring the PyTorch ImprovedCMCE.forward (eval-mode BN)."""
    w1, w2, wm, bn_scale, bn_bias, wo = params
    B, C2, H, W = x_nchw.shape
    C = C2 // 2
    fa = x_nchw[:, :C]
    fb = x_nchw[:, C:]

    def att(f):
        p = jnp.mean(f, axis=(2, 3))                      # (B, C)
        s = jax.nn.sigmoid(jax.nn.relu(p @ w1) @ w2)      # (B, C)
        return s[:, :, None, None]

    wa = att(fa)
    wb = att(fb)
    fa_e = fa + fb * wa
    fb_e = fb + fa * wb
    cat = jnp.concatenate([fa, fb], axis=1)
    fused = jnp.einsum('bihw,oi->bohw', cat, wm)
    fused = jax.nn.relu(fused * bn_scale.reshape(1, C, 1, 1)
                        + bn_bias.reshape(1, C, 1, 1))
    fa_n = fa_e + fused
    fb_n = fb_e + fused
    cat2 = jnp.concatenate([fa_n, fb_n], axis=1)
    return jax.nn.relu(jnp.einsum('bihw,oi->bohw', cat2, wo))


if __name__ == "__main__":
    channels = 4          # module arg -> input has 2*channels = 8 channels
    B, H, W = 2, 16, 16

    key = jax.random.PRNGKey(0)
    kx, kp = jax.random.split(key)
    x = jax.random.normal(kx, (B, 2 * channels, H, W), jnp.float32)
    params = init_params(channels, kp)

    out = jax.block_until_ready(jax.jit(improved_cmce)(x, params))
    ref = jax.block_until_ready(reference_cmce(x, params))

    assert out.shape == (B, 2 * channels, H, W), out.shape
    err = float(jnp.max(jnp.abs(out - ref)))
    assert jnp.allclose(out, ref, atol=1e-4, rtol=1e-4), err
    print("KERNEL_OK")
</pallas_src>

<mosaic_0001>
module attributes {stable_mosaic.version = 11 : i64} {
  func.func @cmce_kernel(%arg0: i32, %arg1: i32, %arg2: memref<1x8x256xf32, #tpu.memory_space<vmem>>, %arg3: memref<1x8x8xf32, #tpu.memory_space<vmem>>, %arg4: memref<4x8xf32, #tpu.memory_space<vmem>>, %arg5: memref<4x1xf32, #tpu.memory_space<vmem>>, %arg6: memref<8x4xf32, #tpu.memory_space<vmem>>, %arg7: memref<1x8x256xf32, #tpu.memory_space<vmem>>) attributes {dimension_semantics = [#tpu.dimension_semantics<parallel>, #tpu.dimension_semantics<parallel>], iteration_bounds = array<i64: 2, 1>, scalar_prefetch = 0 : i64, scratch_operands = 0 : i64, tpu.core_type = #tpu.core_type<tc>, window_params = [{transform_indices = @transform_0, window_bounds = array<i64: 1, 8, 256>}, {transform_indices = @transform_1, window_bounds = array<i64: 1, 8, 8>}, {pipeline_mode = #tpu.pipeline_mode<synchronous>, transform_indices = @transform_2, window_bounds = array<i64: 4, 8>}, {pipeline_mode = #tpu.pipeline_mode<synchronous>, transform_indices = @transform_3, window_bounds = array<i64: 4, 1>}, {pipeline_mode = #tpu.pipeline_mode<synchronous>, transform_indices = @transform_4, window_bounds = array<i64: 8, 4>}, {transform_indices = @transform_5, window_bounds = array<i64: 1, 8, 256>}]} {
    %c0 = arith.constant 0 : index
    %c0_0 = arith.constant 0 : index
    %c0_1 = arith.constant 0 : index
    %0 = vector.load %arg2[%c0, %c0_0, %c0_1] : memref<1x8x256xf32, #tpu.memory_space<vmem>>, vector<1x8x256xf32>
    %1 = vector.shape_cast %0 : vector<1x8x256xf32> to vector<8x256xf32>
    %c0_2 = arith.constant 0 : index
    %c0_3 = arith.constant 0 : index
    %c0_4 = arith.constant 0 : index
    %2 = vector.load %arg3[%c0_2, %c0_3, %c0_4] : memref<1x8x8xf32, #tpu.memory_space<vmem>>, vector<1x8x8xf32>
    %3 = vector.shape_cast %2 : vector<1x8x8xf32> to vector<8x8xf32>
    %c0_5 = arith.constant 0 : index
    %c0_6 = arith.constant 0 : index
    %4 = vector.load %arg4[%c0_5, %c0_6] : memref<4x8xf32, #tpu.memory_space<vmem>>, vector<4x8xf32>
    %cst = arith.constant dense<0.000000e+00> : vector<4x256xf32>
    %5 = tpu.matmul %4, %1, %cst {dimension_numbers = #tpu.dot_dimension_numbers<[1], [0], [0], [1], [0, 0, 1, 1], [], []>} : vector<4x8xf32>, vector<8x256xf32>, vector<4x256xf32> -> vector<4x256xf32>
    %c0_7 = arith.constant 0 : index
    %c0_8 = arith.constant 0 : index
    %6 = vector.load %arg5[%c0_7, %c0_8] : memref<4x1xf32, #tpu.memory_space<vmem>>, vector<4x1xf32>
    %7 = vector.broadcast %6 : vector<4x1xf32> to vector<4x256xf32>
    %8 = arith.addf %5, %7 : vector<4x256xf32>
    %cst_9 = arith.constant 0.000000e+00 : f32
    %9 = vector.broadcast %cst_9 : f32 to vector<4x256xf32>
    %10 = arith.maximumf %8, %9 : vector<4x256xf32>
    %cst_10 = arith.constant dense<0.000000e+00> : vector<8x256xf32>
    %11 = tpu.matmul %3, %1, %cst_10 {dimension_numbers = #tpu.dot_dimension_numbers<[1], [0], [0], [1], [0, 0, 1, 1], [], []>} : vector<8x8xf32>, vector<8x256xf32>, vector<8x256xf32> -> vector<8x256xf32>
    %c0_11 = arith.constant 0 : index
    %c0_12 = arith.constant 0 : index
    %12 = vector.load %arg6[%c0_11, %c0_12] : memref<8x4xf32, #tpu.memory_space<vmem>>, vector<8x4xf32>
    %cst_13 = arith.constant dense<0.000000e+00> : vector<8x256xf32>
    %13 = tpu.matmul %12, %10, %cst_13 {dimension_numbers = #tpu.dot_dimension_numbers<[1], [0], [0], [1], [0, 0, 1, 1], [], []>} : vector<8x4xf32>, vector<4x256xf32>, vector<8x256xf32> -> vector<8x256xf32>
    %14 = arith.addf %11, %13 : vector<8x256xf32>
    %cst_14 = arith.constant 0.000000e+00 : f32
    %15 = vector.broadcast %cst_14 : f32 to vector<8x256xf32>
    %16 = arith.maximumf %14, %15 : vector<8x256xf32>
    %c0_15 = arith.constant 0 : index
    %c0_16 = arith.constant 0 : index
    %c0_17 = arith.constant 0 : index
    %17 = vector.load %arg7[%c0_15, %c0_16, %c0_17] : memref<1x8x256xf32, #tpu.memory_space<vmem>>, vector<1x8x256xf32>
    %18 = vector.shape_cast %17 : vector<1x8x256xf32> to vector<8x256xf32>
    %19 = vector.shape_cast %16 : vector<8x256xf32> to vector<1x8x256xf32>
    tpu.vector_store %arg7[%c0_15, %c0_16, %c0_17], %19 {strides = array<i32>} : memref<1x8x256xf32, #tpu.memory_space<vmem>>, vector<1x8x256xf32>,
    return
  }
  func.func @transform_0(%arg0: i32, %arg1: i32) -> (i32, i32, i32) {
    %c0_i32 = arith.constant 0 : i32
    %c0_i32_0 = arith.constant 0 : i32
    return %arg0, %c0_i32, %arg1 : i32, i32, i32
  }
  func.func @transform_1(%arg0: i32, %arg1: i32) -> (i32, i32, i32) {
    %c0_i32 = arith.constant 0 : i32
    %c0_i32_0 = arith.constant 0 : i32
    %c0_i32_1 = arith.constant 0 : i32
    return %arg0, %c0_i32, %c0_i32_0 : i32, i32, i32
  }
  func.func @transform_2(%arg0: i32, %arg1: i32) -> (i32, i32) {
    %c0_i32 = arith.constant 0 : i32
    %c0_i32_0 = arith.constant 0 : i32
    %c0_i32_1 = arith.constant 0 : i32
    return %c0_i32, %c0_i32_0 : i32, i32
  }
  func.func @transform_3(%arg0: i32, %arg1: i32) -> (i32, i32) {
    %c0_i32 = arith.constant 0 : i32
    %c0_i32_0 = arith.constant 0 : i32
    %c0_i32_1 = arith.constant 0 : i32
    return %c0_i32, %c0_i32_0 : i32, i32
  }
  func.func @transform_4(%arg0: i32, %arg1: i32) -> (i32, i32) {
    %c0_i32 = arith.constant 0 : i32
    %c0_i32_0 = arith.constant 0 : i32
    %c0_i32_1 = arith.constant 0 : i32
    return %c0_i32, %c0_i32_0 : i32, i32
  }
  func.func @transform_5(%arg0: i32, %arg1: i32) -> (i32, i32, i32) {
    %c0_i32 = arith.constant 0 : i32
    %c0_i32_0 = arith.constant 0 : i32
    return %arg0, %c0_i32, %arg1 : i32, i32, i32
  }
}

</mosaic_0001>

<bundles_post_ra>
// kernel: improved_cmce.1
= control target key start
LH: loop header
LB: loop body
LE: loop exit
PB: predicated region body
PF: predicated region fallthrough
CT: control target
= control target key end

     0   :  { %s730_s18 = smov 0   ;;  %s732_s19 = smov 0   ;;  %s783_s0 = inlined_call_operand.vmem [shape: f32[2,8,256], index: 0, kind: input, shape index: {}]   ;;  %s784_s1 = inlined_call_operand.vmem [shape: f32[2,8,8], index: 1, kind: input, shape index: {}]   ;;  %s785_s2 = inlined_call_operand.vmem [shape: f32[4,8], index: 2, kind: input, shape index: {}]   ;;  %s786_s3 = inlined_call_operand.vmem [shape: f32[4,1], index: 3, kind: input, shape index: {}]   ;;  %s787_s4 = inlined_call_operand.vmem [shape: f32[8,4], index: 4, kind: input, shape index: {}]   ;;  %s788_s5 = inlined_call_operand.vmem [shape: f32[2,8,256], index: 5, kind: output, shape index: {}]  }
   0x1   :  { %s734_s20 = smov 0  }
   0x2 LB: > { %s27_s21 = sadd.s32 1, %s692_s19  ;;  %p632_p0 = scmp.ge.s32.totalorder %s696_s20, 1  ;;  %s696_s20 = sphi %s734_s20, %s15_s20   ;;  %s692_s19 = sphi %s732_s19, %s790_s19   ;;  %s688_s18 = sphi %s730_s18, %s789_s18  }
   0x3   : > { %p29_p1 = scmp.ge.s32.totalorder %s27_s21, 2  ;;  %p217_p2 = scmp.lt.s32.totalorder %s696_s20, 3 }
   0x5   : > { %s792_s21 = smov (%p29_p1, %s27_s21), 0  ;;  %p218_p3 = pnand %p632_p0, %p217_p2 }
   0x6   : > { %p258_p4 = scmp.lt.s32.totalorder (!%p218_p3), %s688_s18, 1 }
   0x7   : > { %221 = sbr.rel (%p218_p3) target bundleno = 419 (0x1a3), region = 40 }
   0xc   : > { %v698_v0 = vmov 0.0   ;;  %v699_v1 = vmov 0   ;;  %v285_v2 = vld [vmem:[%s786_s3] sm:$0xf]  ;;  %s794_s18 = smov (!%p258_p4, %s688_s18), 1  ;;  %vm291_vm0 = vcmask 64512  }
   0xd   : > { %359 = vmatprep.mubr.f32.mxu0 %v698_v0  ;;  %673 = vset.pattern.permute.xlu0 %v699_v1  ;;  %s645_s24 = sshll.u32 %s794_s18, 4  ;;  %v284_v5 = vld [vmem:[%s785_s2] sm:$0xf]  ;;  %s635_s30 = sshll.u32 %s794_s18, 3  ;;  %vm373_vm1 = vcmask 1043456   ;;  %vm369_vm2 = vcmask 31744  }
   0xe   : > { %288 = vperm.xlu0 %673, %v285_v2   ;;  %444 = vmatprep.mubr.f32.mxu1 %v698_v0  ;;  %s265_s27 = scalar_lea.vmem %s783_s0, %s645_s24  ;;  %s270_s8 = scalar_lea.vmem %s784_s1, %s635_s30  ;;  %v368_v14 = vld [vmem:[%s787_s4] sm:$0xff] }
   0xf   : > { %v282_v3 = vld [vmem:[%s265_s27 + $0x8] sm:$0xff]  ;;  %v281_v4 = vld [vmem:[%s265_s27] sm:$0xff]  ;;  %s279_s13 = scalar_lea.vmem %s788_s5, %s645_s24 }
  0x10   : > { %325 = vmatprep.subr.mxu0 %v282_v3  ;;  %v283_v6 = vld [vmem:[%s270_s8] sm:$0xff] }
  0x11   : > { %326 = vmatpush1.msra.mxu0 %v281_v4 }
  0x12   : > { %638 = vmatmul.mubr.msk.f32.vlgmr.msra.gmra.mxu0 %vm291_vm0, %v284_v5  ;;  %484 = vmatprep.subr.mxu0 %v282_v3 }
  0x13   : > { %485 = vmatpush1.msra.mxu0 %v281_v4  ;;  %518 = vmatprep.mubr.f32.mxu0 %v698_v0 }
  0x16   : > { %642 = vmatmul.mubr.msk.f32.vlgmr.msra.gmra.mxu0 %vm291_vm0, %v283_v6 }
  0x89   : > { %v289_v7 = vpop.permute.xlu0 %288 }
  0xd2   : > { %v361_v8 = vpop.f32.mrf.mxu0 }
  0xd3   : > { %v362_v9 = vadd.f32 %v361_v8, %v289_v7 }
  0xd4   : > { %v363_v10 = vpop.f32.mrf.mxu0 }
  0xd5   : > { %v364_v11 = vadd.f32 %v363_v10, %v289_v7  ;;  %v366_v13 = vmax.f32 %v362_v9, 0.0 }
  0xd6   : > { %v520_v15 = vpop.f32.mrf.mxu0 }
  0xd7   : > { %v367_v12 = vmax.f32 %v364_v11, 0.0 }
  0xd8   : > { %v522_v18 = vpop.f32.mrf.mxu0 }
  0xd9   : > { %639 = vmatprep.subr.msk.mxu1 %vm373_vm1, %v367_v12 }
  0xda   : > { %640 = vmatpush1.msk.msra.mxu1 %vm373_vm1, %v366_v13 }
  0xdb   : > { %641 = vmatmul.mubr.msk.f32.vlgmr.msra.gmra.mxu1 %vm369_vm2, %v368_v14 }
 0x19b   : > { %v446_v16 = vpop.f32.mrf.mxu1 }
 0x19c   : > { %v521_v17 = vadd.f32 %v520_v15, %v446_v16 }
 0x19d   : > { %v448_v19 = vpop.f32.mrf.mxu1 }
 0x19e   : > { %v525_v20 = vmax.f32 %v521_v17, 0.0  ;;  %v523_v21 = vadd.f32 %v522_v18, %v448_v19 }
 0x1a0   : > { %527 = vst [vmem:[%s279_s13] sm:$0xff] %v525_v20  ;;  %v526_v22 = vmax.f32 %v523_v21, 0.0 }
 0x1a2   : > { %528 = vst [vmem:[%s279_s13 + $0x8] sm:$0xff] %v526_v22 }
 0x1a3 PF: > { %s15_s20 = sadd.s32 1, %s696_s20   ;;  %s789_s18 = smov %s692_s19 }
 0x1a4   : > { %p12_p5 = scmp.ge.s32.totalorder %s15_s20, 4   ;;  %s790_s19 = smov %s792_s21 }
 0x1a6   :  { %14 = sbr.rel (!%p12_p5) target bundleno = 2 (0x2), region = 73 }

</bundles_post_ra>
